<compile_context>
chip_gen: v5e
topology: v5e:2x2
jax: 0.10.0
libtpu: 0.0.40
codegen_flags: <defaults>
</compile_context>

<pallas_src>
import functools

import numpy as np
import jax
import jax.numpy as jnp
from jax import lax
from jax.experimental import pallas as pl
from jax.experimental.pallas import tpu as pltpu


def _mixed_conv_kernel(x_ref, w_ref, m_ref, o_ref, *, W):
    """Folded mixed-op 3x3 conv as ONE MXU matmul.

    x_ref: (N*C, R)          sublane-packed input, R = H*W on lanes
    w_ref: (N*Co, 9*N*C+1)   folded per-tap weights (block-diag over batch),
                             bias in the last column
    m_ref: (9*N*C+1, R)      per-tap boundary masks (last row all-ones)
    o_ref: (N*Co, R)
    """
    R = x_ref.shape[1]
    x = x_ref[...]                                   # (N*C, R) f32

    rows = []
    for di in range(3):
        for dj in range(3):
            off = (di - 1) * W + (dj - 1)            # flat source offset of tap
            # tap[p, r] = x[p, r + off]  (per-row XLU lane rotation; wrap-around
            # positions are zeroed by the masks below)
            rows.append(x if off == 0
                        else pltpu.roll(x, shift=(-off) % R, axis=1))
    rows.append(jnp.ones((1, R), jnp.float32))       # ones row -> bias column

    # (9*N*C+1, R) contraction tensor; ONE fused VPU multiply applies all the
    # conv-padding masks (mask rows for the centre tap / bias row are ones).
    taps = jnp.concatenate(rows, axis=0) * m_ref[...]

    # Single (N*Co, K) x (K, R) MXU matmul; bias rides in via the ones row.
    # Operands kept f32 for the 1e-4 check; cast to bf16 for production C.
    o_ref[...] = jnp.dot(w_ref[...], taps,
                         preferred_element_type=jnp.float32).astype(o_ref.dtype)


def mixed_operation(x_nchw, alpha, w3, b3, w1, b1):
    """alpha: (4,) raw arch weights; w3: (3,3,C,Co) HWIO; b3: (Co,);
    w1: (Cin, Cout); b1: (Co,).  Returns NCHW output."""
    N, C, H, W = x_nchw.shape
    Co = w3.shape[-1]
    # identity / avg-pool branches are channel-preserving -> need Co == C
    assert Co == C, "MixedOperation fusion requires Cout == Cin"
    R = H * W
    NC, NCo = N * C, N * Co
    K = 9 * NC + 1

    # ---- fold softmax(weights) + all four linear ops into one 3x3 conv ----
    sm = jax.nn.softmax(alpha.astype(jnp.float32))
    eye = jnp.eye(C, dtype=jnp.float32)
    w_eff = sm[0] * w3.astype(jnp.float32) + (sm[3] / 9.0) * eye[None, None]
    w_eff = w_eff.at[1, 1].add(sm[1] * w1.astype(jnp.float32) + sm[2] * eye)
    b_eff = sm[0] * b3.astype(jnp.float32) + sm[1] * b1.astype(jnp.float32)

    # per-tap (Co, C) weights, tap index t = di*3 + dj
    w_tap = jnp.transpose(w_eff, (0, 1, 3, 2)).reshape(9, Co, C)
    # single lane-dense weight matrix, block-diagonal over batch, + bias col:
    #   w_big[n*Co+o, t*N*C + m*C + c] = (n == m) * w_tap[t, o, c]
    #   w_big[n*Co+o, 9*N*C]           = b_eff[o]
    w_blk = jnp.einsum('nm,toc->notmc', jnp.eye(N, dtype=jnp.float32),
                       w_tap).reshape(NCo, 9 * NC)
    b_col = jnp.tile(b_eff, N).reshape(NCo, 1)
    w_big = jnp.concatenate([w_blk, b_col], axis=1)          # (NCo, K)

    # compile-time tap masks (numpy -> constant folded): zero where the tap's
    # source falls in the conv padding; also neutralise roll wrap-around.
    # Last row (bias row) stays all-ones.
    r = np.arange(R)
    col, row = r % W, r // W
    masks = np.ones((K, R), np.float32)
    t = 0
    for di in range(3):
        for dj in range(3):
            m = np.ones(R, bool)
            if di == 0:
                m &= row >= 1
            elif di == 2:
                m &= row <= H - 2
            if dj == 0:
                m &= col >= 1
            elif dj == 2:
                m &= col <= W - 2
            masks[t * NC:(t + 1) * NC, :] = m.astype(np.float32)[None, :]
            t += 1
    masks = jnp.asarray(masks)

    # NCHW -> (N*C, H*W): free reshape; spatial on lanes (R=256 -> unmasked
    # full-width stores), batch*channels packed on sublanes (8/8 rows used).
    x2d = x_nchw.astype(jnp.float32).reshape(NC, R)

    out2d = pl.pallas_call(
        functools.partial(_mixed_conv_kernel, W=W),
        out_shape=jax.ShapeDtypeStruct((NCo, R), jnp.float32),
        # Single step (no grid): whole problem is ~100 KiB of VMEM, far under
        # every scoped limit, and one step avoids ~0.35 us/step overhead.
        # For real supernet shapes, add a "parallel" batch/H-tile grid axis
        # and size tiles against v7x's 64 MiB VMEM (vmem_limit_bytes).
        in_specs=[
            pl.BlockSpec(memory_space=pltpu.MemorySpace.VMEM),   # x2d
            pl.BlockSpec(memory_space=pltpu.MemorySpace.VMEM),   # folded weights
            pl.BlockSpec(memory_space=pltpu.MemorySpace.VMEM),   # masks (+ bias row)
        ],
        out_specs=pl.BlockSpec(memory_space=pltpu.MemorySpace.VMEM),
    )(x2d, w_big, masks)

    return out2d.reshape(N, Co, H, W)          # free reshape back to NCHW


def mixed_operation_ref(x_nchw, alpha, w3, b3, w1, b1):
    """Pure-JAX reference (mirrors the PyTorch forward) for verification."""
    sm = jax.nn.softmax(alpha.astype(jnp.float32))
    x = jnp.transpose(x_nchw, (0, 2, 3, 1)).astype(jnp.float32)
    dn = ("NHWC", "HWIO", "NHWC")
    y3 = lax.conv_general_dilated(x, w3, (1, 1), ((1, 1), (1, 1)),
                                  dimension_numbers=dn) + b3
    y1 = lax.conv_general_dilated(x, w1.reshape(1, 1, *w1.shape), (1, 1),
                                  ((0, 0), (0, 0)), dimension_numbers=dn) + b1
    yid = x
    yp = lax.reduce_window(x, 0.0, lax.add, (1, 3, 3, 1), (1, 1, 1, 1),
                           ((0, 0), (1, 1), (1, 1), (0, 0))) / 9.0
    out = sm[0] * y3 + sm[1] * y1 + sm[2] * yid + sm[3] * yp
    return jnp.transpose(out, (0, 3, 1, 2))


if __name__ == "__main__":
    key = jax.random.PRNGKey(0)
    kx, ka, kw3, kb3, kw1, kb1 = jax.random.split(key, 6)

    N, C, H, W = 2, 4, 16, 16
    x = jax.random.normal(kx, (N, C, H, W), jnp.float32)          # NCHW like PyTorch
    alpha = jax.random.normal(ka, (4,), jnp.float32)              # nn.Parameter(randn(4))
    w3 = 0.1 * jax.random.normal(kw3, (3, 3, C, C), jnp.float32)  # HWIO conv3x3 weight
    b3 = 0.1 * jax.random.normal(kb3, (C,), jnp.float32)
    w1 = 0.1 * jax.random.normal(kw1, (C, C), jnp.float32)        # (Cin, Cout) conv1x1
    b1 = 0.1 * jax.random.normal(kb1, (C,), jnp.float32)

    mixed_op = jax.jit(mixed_operation)
    out = jax.block_until_ready(mixed_op(x, alpha, w3, b3, w1, b1))

    ref = mixed_operation_ref(x, alpha, w3, b3, w1, b1)
    assert out.shape == (N, C, H, W)
    assert jnp.allclose(out, ref, atol=1e-4, rtol=1e-4), "mismatch vs reference"
    print("KERNEL_OK")
</pallas_src>

<mosaic_0001>
module attributes {stable_mosaic.version = 11 : i64} {
  func.func @_mixed_conv_kernel(%arg0: memref<8x256xf32, #tpu.memory_space<vmem>>, %arg1: memref<8x73xf32, #tpu.memory_space<vmem>>, %arg2: memref<73x256xf32, #tpu.memory_space<vmem>>, %arg3: memref<8x256xf32, #tpu.memory_space<vmem>>) attributes {dimension_semantics = [], scalar_prefetch = 0 : i64, scratch_operands = 0 : i64, tpu.core_type = #tpu.core_type<tc>} {
    %c0 = arith.constant 0 : index
    %c0_0 = arith.constant 0 : index
    %0 = vector.load %arg0[%c0, %c0_0] : memref<8x256xf32, #tpu.memory_space<vmem>>, vector<8x256xf32>
    %c17_i32 = arith.constant 17 : i32
    %1 = tpu.dynamic_rotate %0 by %c17_i32 dim 1 : vector<8x256xf32>, i32 -> vector<8x256xf32>
    %c16_i32 = arith.constant 16 : i32
    %2 = tpu.dynamic_rotate %0 by %c16_i32 dim 1 : vector<8x256xf32>, i32 -> vector<8x256xf32>
    %c15_i32 = arith.constant 15 : i32
    %3 = tpu.dynamic_rotate %0 by %c15_i32 dim 1 : vector<8x256xf32>, i32 -> vector<8x256xf32>
    %c1_i32 = arith.constant 1 : i32
    %4 = tpu.dynamic_rotate %0 by %c1_i32 dim 1 : vector<8x256xf32>, i32 -> vector<8x256xf32>
    %c255_i32 = arith.constant 255 : i32
    %5 = tpu.dynamic_rotate %0 by %c255_i32 dim 1 : vector<8x256xf32>, i32 -> vector<8x256xf32>
    %c241_i32 = arith.constant 241 : i32
    %6 = tpu.dynamic_rotate %0 by %c241_i32 dim 1 : vector<8x256xf32>, i32 -> vector<8x256xf32>
    %c240_i32 = arith.constant 240 : i32
    %7 = tpu.dynamic_rotate %0 by %c240_i32 dim 1 : vector<8x256xf32>, i32 -> vector<8x256xf32>
    %c239_i32 = arith.constant 239 : i32
    %8 = tpu.dynamic_rotate %0 by %c239_i32 dim 1 : vector<8x256xf32>, i32 -> vector<8x256xf32>
    %cst = arith.constant 1.000000e+00 : f32
    %9 = vector.broadcast %cst : f32 to vector<1x256xf32>
    %10 = tpu.concatenate %1, %2, %3, %4, %0, %5, %6, %7, %8, %9 in 0 : vector<8x256xf32>, vector<8x256xf32>, vector<8x256xf32>, vector<8x256xf32>, vector<8x256xf32>, vector<8x256xf32>, vector<8x256xf32>, vector<8x256xf32>, vector<8x256xf32>, vector<1x256xf32> -> vector<73x256xf32>
    %c0_1 = arith.constant 0 : index
    %c0_2 = arith.constant 0 : index
    %11 = vector.load %arg2[%c0_1, %c0_2] : memref<73x256xf32, #tpu.memory_space<vmem>>, vector<73x256xf32>
    %12 = arith.mulf %10, %11 : vector<73x256xf32>
    %c0_3 = arith.constant 0 : index
    %c0_4 = arith.constant 0 : index
    %13 = vector.load %arg1[%c0_3, %c0_4] : memref<8x73xf32, #tpu.memory_space<vmem>>, vector<8x73xf32>
    %cst_5 = arith.constant dense<0.000000e+00> : vector<8x256xf32>
    %14 = tpu.matmul %13, %12, %cst_5 {dimension_numbers = #tpu.dot_dimension_numbers<[1], [0], [0], [1], [0, 0, 1, 1], [], []>} : vector<8x73xf32>, vector<73x256xf32>, vector<8x256xf32> -> vector<8x256xf32>
    %c0_6 = arith.constant 0 : index
    %c0_7 = arith.constant 0 : index
    %15 = vector.load %arg3[%c0_6, %c0_7] : memref<8x256xf32, #tpu.memory_space<vmem>>, vector<8x256xf32>
    tpu.vector_store %arg3[%c0_6, %c0_7], %14 {strides = array<i32>} : memref<8x256xf32, #tpu.memory_space<vmem>>, vector<8x256xf32>,
    return
  }
}

</mosaic_0001>

<bundles_post_ra>
// kernel: tile.8
= control target key start
LH: loop header
LB: loop body
LE: loop exit
PB: predicated region body
PF: predicated region fallthrough
CT: control target
= control target key end

     0   :  { %s22_s0 = inlined_call_operand.vmem [shape: f32[4], index: 0, kind: input, shape index: {}]   ;;  %s23_s1 = inlined_call_operand.vmem [shape: f32[2,4], index: 1, kind: output, shape index: {}]  }
   0x1   :  { %v4_v0 = vld [vmem:[%s22_s0] ss:$0 sm:$0xff] }
   0x2   :  { %5 = vst [vmem:[%s23_s1] sm:$0x3] %v4_v0 }

// kernel: tile.0
= control target key start
LH: loop header
LB: loop body
LE: loop exit
PB: predicated region body
PF: predicated region fallthrough
CT: control target
= control target key end

     0   :  { %s34_s8 = smov 125   ;;  %s35_s9 = smov 126   ;;  %vm7_vm0 = vcmask 7168   ;;  %s61_s0 = inlined_call_operand.vmem [shape: f32[2,4], index: 0, kind: input, shape index: {}]   ;;  %s62_s1 = inlined_call_operand.vmem [shape: f32[8,1], index: 1, kind: output, shape index: {}]  }
   0x1   :  { %v4_v0 = vld [vmem:[%s61_s0] sm:$0x3]  ;;  %s33_s0 = smov 127  }
   0x2   :  { %5 = vst [vmem:[#allocation0] sm:$0x3] %v4_v0 }
   0x9   :  { %v9_v1 = vld [vmem:[#allocation0] sm:$0x3]  }
   0xa   :  { %v21_v2 = vld [vmem:[#allocation0] sm:$0x3]   ;;  %10 = vrot.lane.b32.xlu0 %v9_v1, %s33_s0 }
   0xb   :  { %22 = vrot.lane.b32.xlu1 %v21_v2, %s34_s8  ;;  %v15_v3 = vld [vmem:[#allocation0] sm:$0x3]  }
   0xc   :  { %v6_v4 = vld [vmem:[#allocation0] sm:$0x3]  }
   0xd   :  { %8 = vst.msk [vmem:[%s62_s1] ss:$4 sm:$0x3] %vm7_vm0, %v6_v4  }
  0x12   :  { %16 = vrot.lane.b32.xlu0 %v15_v3, %s35_s9 }
  0x7c   :  { %v11_v5 = vpop.permute.xlu0 %10  }
  0x7d   :  { %v23_v6 = vpop.permute.xlu1 %22   ;;  %27 = vst.msk [vmem:[%s62_s1 + $0x1] ss:$4 sm:$0x3] %vm7_vm0, %v11_v5  }
  0x7e   :  { %29 = vst.msk [vmem:[%s62_s1 + $0x3] ss:$4 sm:$0x3] %vm7_vm0, %v23_v6  }
  0x84   :  { %v17_v7 = vpop.permute.xlu0 %16  }
  0x85   :  { %28 = vst.msk [vmem:[%s62_s1 + $0x2] ss:$4 sm:$0x3] %vm7_vm0, %v17_v7  }

// kernel: mixed_operation.1
= control target key start
LH: loop header
LB: loop body
LE: loop exit
PB: predicated region body
PF: predicated region fallthrough
CT: control target
= control target key end

     0   :  { %s182_s14 = smov 112   ;;  %s183_s15 = smov 111   ;;  %vm117_vm0 = vcmask 1040384   ;;  %v20_v5 = vlaneseq  ;;  %vm113_vm9 = vcmask 596992   ;;  %s317_s0 = inlined_call_operand.vmem [shape: f32[8,256], index: 0, kind: input, shape index: {}]   ;;  %s318_s2 = inlined_call_operand.vmem [shape: f32[73,256], index: 2, kind: input, shape index: {}]   ;;  %s319_s1 = inlined_call_operand.vmem [shape: f32[8,73], index: 1, kind: input, shape index: {}]   ;;  %s320_s3 = inlined_call_operand.vmem [shape: f32[8,256], index: 3, kind: output, shape index: {}]  }
   0x1   :  { %v213_v0 = vld [vmem:[%s317_s0] sm:$0xff]  ;;  %s184_s16 = smov 113   ;;  %v221_v1 = vld [vmem:[%s317_s0 + $0x8] sm:$0xff]  ;;  %s185_s19 = smov 127   ;;  %v92_v2 = vld [vmem:[%s318_s2 + $0x90] sm:$0x1] }
   0x2   :  { %60 = vrot.lane.b32.xlu1 %v213_v0, %s182_s14  ;;  %67 = vrot.lane.b32.xlu0 %v213_v0, %s183_s15  ;;  %s186_s20 = smov 1   ;;  %s187_s21 = smov 15   ;;  %v93_v3 = vld [vmem:[%s318_s2 + $0x98] sm:$0x1]  ;;  %v242_v8 = vand.u32 127, %v20_v5  ;;  %v90_v10 = vld [vmem:[%s318_s2 + $0x80] sm:$0xff] }
   0x3   :  { %53 = vrot.lane.b32.xlu2 %v213_v0, %s184_s16  ;;  %s188_s0 = smov 16   ;;  %s189_s22 = smov 17   ;;  %170 = vmatpush.msk.msra.mxu0 %vm117_vm0, %v92_v2  ;;  %v91_v11 = vld [vmem:[%s318_s2 + $0x88] sm:$0xff]  ;;  %v88_v18 = vld [vmem:[%s318_s2 + $0x70] sm:$0xff]  ;;  %v89_v19 = vld [vmem:[%s318_s2 + $0x78] sm:$0xff] }
   0x4   :  { %172 = vmatpush.msk.msra.mxu1 %vm117_vm0, %v93_v3  ;;  %vm64_vm1 = vcmp.lt.s32.totalorder %v242_v8, 112  ;;  %vm71_vm2 = vcmp.lt.s32.totalorder %v242_v8, 111  ;;  %vm57_vm3 = vcmp.lt.s32.totalorder %v242_v8, 113  ;;  %v86_v24 = vld [vmem:[%s318_s2 + $0x60] sm:$0xff]  ;;  %v87_v25 = vld [vmem:[%s318_s2 + $0x68] sm:$0xff]  ;;  %vm50_vm4 = vcmp.lt.s32.totalorder %v242_v8, 127 }
   0x5   :  { %v84_v31 = vld [vmem:[%s318_s2 + $0x50] sm:$0xff]  ;;  %v85_v32 = vld [vmem:[%s318_s2 + $0x58] sm:$0xff]  ;;  %v82_v33 = vld [vmem:[%s318_s2 + $0x40] sm:$0xff]  ;;  %vm43_vm5 = vcmp.lt.s32.totalorder %v242_v8, 1  ;;  %vm36_vm6 = vcmp.lt.s32.totalorder %v242_v8, 15  ;;  %vm29_vm7 = vcmp.lt.s32.totalorder %v242_v8, 16 }
   0x6   :  { %v83_v34 = vld [vmem:[%s318_s2 + $0x48] sm:$0xff]  ;;  %v102_v41 = vmul.f32 %v82_v33, %v213_v0  ;;  %v80_v43 = vld [vmem:[%s318_s2 + $0x30] sm:$0xff]  ;;  %v81_v45 = vld [vmem:[%s318_s2 + $0x38] sm:$0xff]  ;;  %vm22_vm8 = vcmp.lt.s32.totalorder %v242_v8, 17 }
   0x7   :  { %v103_v42 = vmul.f32 %v83_v34, %v221_v1  ;;  %v78_v46 = vld [vmem:[%s318_s2 + $0x20] sm:$0xff]  ;;  %v79_v47 = vld [vmem:[%s318_s2 + $0x28] sm:$0xff]  ;;  %v76_v58 = vld [vmem:[%s318_s2 + $0x10] sm:$0xff] }
   0x8   :  { %v77_v59 = vld [vmem:[%s318_s2 + $0x18] sm:$0xff]  ;;  %v74_v3 = vld [vmem:[%s318_s2] sm:$0xff] }
   0xa   :  { %62 = vrot.lane.b32.xlu1 %v221_v1, %s182_s14  ;;  %69 = vrot.lane.b32.xlu0 %v221_v1, %s183_s15 }
   0xb   :  { %55 = vrot.lane.b32.xlu2 %v221_v1, %s184_s16 }
  0x12   :  { %48 = vrot.lane.b32.xlu1 %v221_v1, %s185_s19  ;;  %46 = vrot.lane.b32.xlu0 %v213_v0, %s185_s19 }
  0x13   :  { %39 = vrot.lane.b32.xlu2 %v213_v0, %s186_s20 }
  0x1a   :  { %32 = vrot.lane.b32.xlu1 %v213_v0, %s187_s21  ;;  %41 = vrot.lane.b32.xlu0 %v221_v1, %s186_s20 }
  0x1b   :  { %34 = vrot.lane.b32.xlu2 %v221_v1, %s187_s21 }
  0x22   :  { %27 = vrot.lane.b32.xlu1 %v221_v1, %s188_s0  ;;  %25 = vrot.lane.b32.xlu0 %v213_v0, %s188_s0 }
  0x23   :  { %16 = vrot.lane.b32.xlu2 %v213_v0, %s189_s22 }
  0x2a   :  { %18 = vrot.lane.b32.xlu0 %v221_v1, %s189_s22 }
  0x5d   :  { %v54_v4 = vpop.permute.xlu2 %53 }
  0x65   :  { %v56_v9 = vpop.permute.xlu2 %55 }
  0x66   :  { %v58_v22 = vsel %vm57_vm3, %v54_v4, %v56_v9  ;;  %v59_v23 = vsel %vm57_vm3, %v56_v9, %v54_v4  ;;  %v75_v4 = vld [vmem:[%s318_s2 + $0x8] sm:$0xff] }
  0x67   :  { %v106_v29 = vmul.f32 %v86_v24, %v58_v22  ;;  %v107_v30 = vmul.f32 %v87_v25, %v59_v23 }
  0x6d   :  { %v40_v28 = vpop.permute.xlu2 %39 }
  0x74   :  { %v61_v6 = vpop.permute.xlu1 %60  ;;  %v68_v7 = vpop.permute.xlu0 %67 }
  0x75   :  { %v35_v44 = vpop.permute.xlu2 %34 }
  0x7c   :  { %v63_v12 = vpop.permute.xlu1 %62  ;;  %v70_v13 = vpop.permute.xlu0 %69 }
  0x7d   :  { %v65_v14 = vsel %vm64_vm1, %v61_v6, %v63_v12  ;;  %v66_v15 = vsel %vm64_vm1, %v63_v12, %v61_v6  ;;  %v72_v16 = vsel %vm71_vm2, %v68_v7, %v70_v13  ;;  %v73_v17 = vsel %vm71_vm2, %v70_v13, %v68_v7  ;;  %v17_v2 = vpop.permute.xlu2 %16 }
  0x7e   :  { %v110_v20 = vmul.f32 %v90_v10, %v72_v16  ;;  %v111_v21 = vmul.f32 %v91_v11, %v73_v17  ;;  %v108_v26 = vmul.f32 %v88_v18, %v65_v14  ;;  %v109_v27 = vmul.f32 %v89_v19, %v66_v15  ;;  %v112_v11 = vld [vmem:[%s319_s1] sm:$0xff] }
  0x80   :  { %131 = vmatpush.msra.mxu0 %v110_v20  ;;  %151 = vmatpush.msra.mxu1 %v111_v21 }
  0x82   :  { %132 = vmatpush.msra.mxu0 %v108_v26  ;;  %152 = vmatpush.msra.mxu1 %v109_v27 }
  0x84   :  { %v49_v35 = vpop.permute.xlu1 %48  ;;  %133 = vmatpush.msra.mxu0 %v106_v29  ;;  %153 = vmatpush.msra.mxu1 %v107_v30  ;;  %v47_v36 = vpop.permute.xlu0 %46 }
  0x85   :  { %v51_v37 = vsel %vm50_vm4, %v47_v36, %v49_v35  ;;  %v52_v38 = vsel %vm50_vm4, %v49_v35, %v47_v36 }
  0x86   :  { %v104_v39 = vmul.f32 %v84_v31, %v51_v37  ;;  %v105_v40 = vmul.f32 %v85_v32, %v52_v38 }
  0x88   :  { %134 = vmatpush.msra.mxu0 %v104_v39  ;;  %154 = vmatpush.msra.mxu1 %v105_v40 }
  0x8a   :  { %135 = vmatpush.msra.mxu0 %v102_v41  ;;  %155 = vmatpush.msra.mxu1 %v103_v42 }
  0x8c   :  { %v33_v48 = vpop.permute.xlu1 %32  ;;  %v42_v49 = vpop.permute.xlu0 %41 }
  0x8d   :  { %v44_v50 = vsel %vm43_vm5, %v40_v28, %v42_v49  ;;  %v45_v51 = vsel %vm43_vm5, %v42_v49, %v40_v28  ;;  %v37_v52 = vsel %vm36_vm6, %v33_v48, %v35_v44  ;;  %v38_v53 = vsel %vm36_vm6, %v35_v44, %v33_v48 }
  0x8e   :  { %v100_v54 = vmul.f32 %v80_v43, %v45_v51  ;;  %v101_v55 = vmul.f32 %v81_v45, %v44_v50  ;;  %v98_v56 = vmul.f32 %v78_v46, %v38_v53  ;;  %v99_v57 = vmul.f32 %v79_v47, %v37_v52 }
  0x90   :  { %136 = vmatpush.msra.mxu0 %v100_v54  ;;  %156 = vmatpush.msra.mxu1 %v101_v55 }
  0x92   :  { %137 = vmatpush.msra.mxu0 %v98_v56  ;;  %157 = vmatpush.msra.mxu1 %v99_v57 }
  0x94   :  { %v28_v60 = vpop.permute.xlu1 %27  ;;  %v26_v61 = vpop.permute.xlu0 %25 }
  0x95   :  { %v30_v62 = vsel %vm29_vm7, %v26_v61, %v28_v60  ;;  %v31_v63 = vsel %vm29_vm7, %v28_v60, %v26_v61 }
  0x96   :  { %v96_v0 = vmul.f32 %v76_v58, %v31_v63  ;;  %v97_v1 = vmul.f32 %v77_v59, %v30_v62 }
  0x98   :  { %138 = vmatpush.msra.mxu0 %v96_v0  ;;  %158 = vmatpush.msra.mxu1 %v97_v1 }
  0x9c   :  { %v19_v5 = vpop.permute.xlu0 %18 }
  0x9d   :  { %v23_v6 = vsel %vm22_vm8, %v17_v2, %v19_v5  ;;  %v24_v7 = vsel %vm22_vm8, %v19_v5, %v17_v2 }
  0x9e   :  { %v94_v9 = vmul.f32 %v74_v3, %v24_v7  ;;  %v95_v10 = vmul.f32 %v75_v4, %v23_v6 }
  0xa0   :  { %139 = vmatpush.msra.mxu0 %v94_v9  ;;  %159 = vmatpush.msra.mxu1 %v95_v10 }
  0xa1   :  { %171 = vmatmul.msk.f32.vlgmr.msra.gmra.mxu0 %vm113_vm9, %v112_v11  ;;  %173 = vmatmul.msk.f32.vlgmr.msra.gmra.mxu1 %vm113_vm9, %v112_v11 }
 0x11e   :  { %v141_v8 = vpop.f32.mrf.mxu0  ;;  %v161_v12 = vpop.f32.mrf.mxu1 }
 0x11f   :  { %164 = vst [vmem:[%s320_s3] sm:$0xff] %v141_v8 }
 0x120   :  { %165 = vst [vmem:[%s320_s3 + $0x8] sm:$0xff] %v161_v12 }

</bundles_post_ra>
